<compile_context>
chip_gen: v7x
topology: tpu7x:2x2x1
jax: 0.10.0
libtpu: 0.0.40
codegen_flags: <defaults>
</compile_context>

<pallas_src>
import functools

import jax
import jax.numpy as jnp
from jax.experimental import pallas as pl
from jax.experimental.pallas import tpu as pltpu


def _round_up(a, b):
    return (a + b - 1) // b * b


def _largest_divisor_tile(total, cap, granule=128):
    """Largest multiple of `granule` <= cap that divides `total` (total % granule == 0)."""
    t = max(granule, (min(cap, total) // granule) * granule)
    while total % t:
        t -= granule
    return t


def _default_tuning():
    """(tm, vmem_limit_bytes) tuned per TPU generation."""
    try:
        vmem_cap = pltpu.get_tpu_info().vmem_capacity_bytes
    except Exception:  # info unavailable -> conservative (v7x-safe) defaults
        vmem_cap = 64 * 1024 * 1024
    vmem_limit = min(int(vmem_cap * 3 // 4), 100 * 1024 * 1024)
    # 128-MiB VMEM parts (v5e/v6e): large M tile so the k-loop is MXU-bound, not
    # weight-DMA-bound (v6e needs tm >= ~650 flops/weight-byte). 64-MiB parts (v7x): 512.
    tm = 1024 if vmem_cap >= 100 * 1024 * 1024 else 512
    return tm, vmem_limit


def _apply_activation(h, activation, compute_dtype):
    # h is the f32 MXU output of the first matmul.
    if activation == "relu":
        # relu commutes exactly with the downcast -> do it in bf16 (2x elems per vreg).
        return jnp.maximum(h.astype(compute_dtype), 0)
    if activation == "sigmoid":
        return jax.nn.sigmoid(h).astype(compute_dtype)
    if activation == "tanh":
        return jnp.tanh(h).astype(compute_dtype)
    if activation == "gelu":
        # exact erf form to match torch.nn.GELU() default; approximate=True (tanh form,
        # runs on the EUP slot) is a cheap drop-in if ~1e-3 deviation is acceptable.
        return jax.nn.gelu(h, approximate=False).astype(compute_dtype)
    raise ValueError(f"Activation function {activation} not supported")


def ffn_kernel(x_ref, w1_ref, w2_ref, o_ref, acc_ref, *, activation, num_k,
               compute_dtype):
    # grid = (M tiles [parallel], dff tiles [arbitrary, reduction-last])
    h = jnp.dot(x_ref[...], w1_ref[...], preferred_element_type=jnp.float32)
    h = _apply_activation(h, activation, compute_dtype)
    p = jnp.dot(h, w2_ref[...], preferred_element_type=jnp.float32)

    if num_k == 1:
        # Single reduction step: skip the accumulator entirely.
        o_ref[...] = p.astype(o_ref.dtype)
    else:
        k = pl.program_id(1)

        @pl.when(k == 0)
        def _():
            acc_ref[...] = p                      # no zero-init + "+=" pass

        @pl.when((k > 0) & (k < num_k - 1))
        def _():
            acc_ref[...] += p

        @pl.when(k == num_k - 1)
        def _():
            o_ref[...] = (acc_ref[...] + p).astype(o_ref.dtype)


def prepare_ffn_weights(w1, w2, *, compute_dtype=jnp.bfloat16):
    """One-time pad (to multiples of 128) + cast of the FFN weights.

    Hoists the per-call pad/astype HBM passes out of the forward path; the returned
    arrays can be stored and passed to feed_forward_block directly.
    """
    embed_dim, dff = w1.shape
    assert w2.shape == (dff, embed_dim)
    e_pad = _round_up(embed_dim, 128)
    dff_pad = _round_up(dff, 128)
    w1p = jnp.pad(w1, ((0, e_pad - embed_dim), (0, dff_pad - dff))).astype(compute_dtype)
    w2p = jnp.pad(w2, ((0, dff_pad - dff), (0, e_pad - embed_dim))).astype(compute_dtype)
    return w1p, w2p


def feed_forward_block(x, w1, w2, *, activation="relu", tm=None, tdff=512,
                       compute_dtype=jnp.bfloat16, out_dtype=None,
                       vmem_limit_bytes=None):
    """x: (..., embed_dim) -> (..., embed_dim); matches FeedForwardBlock(use_bias=False).

    w1/w2 may be raw ((E, dff)/(dff, E)) or the padded/cast versions returned by
    prepare_ffn_weights (preferred: avoids per-call pad/cast HBM traffic).
    """
    orig_shape = x.shape
    embed_dim = orig_shape[-1]
    e_pad = _round_up(embed_dim, 128)
    assert w1.shape[0] in (embed_dim, e_pad), "w1 must be (embed_dim[, padded], dff[, padded])"
    assert w2.shape == (w1.shape[1], w1.shape[0])
    dff_pad = _round_up(w1.shape[1], 128)

    out_dtype = out_dtype if out_dtype is not None else x.dtype
    tm_def, vmem_def = _default_tuning()
    tm = tm if tm is not None else tm_def
    vmem_limit_bytes = vmem_limit_bytes if vmem_limit_bytes is not None else vmem_def

    # Weight pad/cast: skipped entirely (no XLA ops emitted) when already prepared.
    if w1.shape != (e_pad, dff_pad) or w1.dtype != compute_dtype:
        w1 = jnp.pad(w1, ((0, e_pad - w1.shape[0]),
                          (0, dff_pad - w1.shape[1]))).astype(compute_dtype)
    if w2.shape != (dff_pad, e_pad) or w2.dtype != compute_dtype:
        w2 = jnp.pad(w2, ((0, dff_pad - w2.shape[0]),
                          (0, e_pad - w2.shape[1]))).astype(compute_dtype)

    x2d = x.reshape(-1, embed_dim)
    m = x2d.shape[0]

    # --- tile selection -------------------------------------------------------
    # M tile: multiple of 16 (bf16 sublane packing); keep >=2 M tiles so the
    # "parallel" axis can feed both v7x TensorCores.
    tm_eff = max(16, min(_round_up(tm, 16), _round_up(m, 16)))
    while pl.cdiv(m, tm_eff) < 2 and tm_eff > 16:
        tm_eff = _round_up(max(16, tm_eff // 2), 16)

    # dff tile: multiple of 128 that divides dff_pad.
    tdff_eff = _largest_divisor_tile(dff_pad, _round_up(tdff, 128))

    c_isz = jnp.dtype(compute_dtype).itemsize
    o_isz = jnp.dtype(out_dtype).itemsize

    def _vmem_need(tm_, td_):
        return (2 * tm_ * e_pad * c_isz        # x tile, double-buffered
                + 2 * e_pad * td_ * c_isz      # w1 tile, double-buffered
                + 2 * td_ * e_pad * c_isz      # w2 tile, double-buffered
                + 2 * tm_ * e_pad * o_isz      # out tile, double-buffered (output dtype)
                + tm_ * e_pad * 4              # f32 accumulator scratch
                + tm_ * td_ * (4 + c_isz))     # f32 intermediate h + compute-dtype copy

    budget = vmem_limit_bytes - (2 << 20)      # headroom for Mosaic internal scratch
    while _vmem_need(tm_eff, tdff_eff) > budget and tdff_eff > 128:
        tdff_eff = _largest_divisor_tile(dff_pad, tdff_eff - 128)
    while _vmem_need(tm_eff, tdff_eff) > budget and tm_eff > 16:
        tm_eff = _round_up(max(16, tm_eff // 2), 16)

    m_pad = _round_up(m, tm_eff)
    if x2d.shape != (m_pad, e_pad) or x2d.dtype != compute_dtype:
        x2d = jnp.pad(x2d, ((0, m_pad - m),
                            (0, e_pad - embed_dim))).astype(compute_dtype)

    grid = (m_pad // tm_eff, dff_pad // tdff_eff)
    num_k = grid[1]

    # Cost hint: weights are re-streamed once per M tile.
    flops = 4 * m_pad * dff_pad * e_pad
    transcendentals = m_pad * dff_pad if activation in ("sigmoid", "tanh", "gelu") else 0
    bytes_accessed = (x2d.size * c_isz
                      + grid[0] * (w1.size + w2.size) * c_isz
                      + m_pad * e_pad * o_isz)

    out = pl.pallas_call(
        functools.partial(ffn_kernel, activation=activation, num_k=num_k,
                          compute_dtype=compute_dtype),
        out_shape=jax.ShapeDtypeStruct((m_pad, e_pad), out_dtype),
        grid=grid,
        in_specs=[
            pl.BlockSpec((tm_eff, e_pad), lambda i, k: (i, 0)),
            pl.BlockSpec((e_pad, tdff_eff), lambda i, k: (0, k)),
            pl.BlockSpec((tdff_eff, e_pad), lambda i, k: (k, 0)),
        ],
        out_specs=pl.BlockSpec((tm_eff, e_pad), lambda i, k: (i, 0)),
        scratch_shapes=[pltpu.VMEM((tm_eff, e_pad), jnp.float32)],
        compiler_params=pltpu.CompilerParams(
            dimension_semantics=("parallel", "arbitrary"),
            vmem_limit_bytes=vmem_limit_bytes),
        cost_estimate=pl.CostEstimate(flops=flops, transcendentals=transcendentals,
                                      bytes_accessed=bytes_accessed),
    )(x2d, w1, w2)

    return out[:m, :embed_dim].reshape(orig_shape)


if __name__ == "__main__":
    # --- test 1: module defaults at toy size (embed_dim=32, dff=4*32=128, relu) ----
    embed_dim, dff, batch, seq = 32, 128, 2, 8
    kx, k1, k2 = jax.random.split(jax.random.PRNGKey(0), 3)
    x = jax.random.normal(kx, (batch, seq, embed_dim), dtype=jnp.float32)
    w1 = jax.random.normal(k1, (embed_dim, dff), dtype=jnp.float32) * 0.05
    w2 = jax.random.normal(k2, (dff, embed_dim), dtype=jnp.float32) * 0.05

    out = jax.block_until_ready(feed_forward_block(x, w1, w2, activation="relu"))
    ref = (jnp.maximum(x.reshape(-1, embed_dim) @ w1, 0.0) @ w2).reshape(x.shape)
    assert out.shape == x.shape
    assert jnp.allclose(out, ref, atol=2e-2, rtol=2e-2), (
        float(jnp.max(jnp.abs(out - ref))))

    # --- test 2: multi-tile grid (2 parallel M tiles x 4 dff tiles), pre-prepared
    #             weights (hoisted pad/cast), tanh activation --------------------
    embed_dim, dff, batch, seq = 128, 512, 2, 64
    kx, k1, k2 = jax.random.split(jax.random.PRNGKey(1), 3)
    x = jax.random.normal(kx, (batch, seq, embed_dim), dtype=jnp.float32)
    w1 = jax.random.normal(k1, (embed_dim, dff), dtype=jnp.float32) * 0.05
    w2 = jax.random.normal(k2, (dff, embed_dim), dtype=jnp.float32) * 0.05
    w1p, w2p = prepare_ffn_weights(w1, w2)   # one-time pad/cast, hoisted out of the call

    out = jax.block_until_ready(
        feed_forward_block(x, w1p, w2p, activation="tanh", tm=64, tdff=128))
    ref = (jnp.tanh(x.reshape(-1, embed_dim) @ w1) @ w2).reshape(x.shape)
    assert out.shape == x.shape
    assert jnp.allclose(out, ref, atol=2e-2, rtol=2e-2), (
        float(jnp.max(jnp.abs(out - ref))))

    print("KERNEL_OK")
</pallas_src>

<mosaic_0001>
module attributes {stable_mosaic.version = 11 : i64} {
  func.func @ffn_kernel(%arg0: i32, %arg1: i32, %arg2: memref<16x128xbf16, #tpu.memory_space<vmem>>, %arg3: memref<128x128xbf16, #tpu.memory_space<vmem>>, %arg4: memref<128x128xbf16, #tpu.memory_space<vmem>>, %arg5: memref<16x128xf32, #tpu.memory_space<vmem>>, %arg6: memref<16x128xf32, #tpu.memory_space<vmem>>) attributes {dimension_semantics = [#tpu.dimension_semantics<parallel>, #tpu.dimension_semantics<arbitrary>], iteration_bounds = array<i64: 1, 1>, scalar_prefetch = 0 : i64, scratch_operands = 1 : i64, tpu.core_type = #tpu.core_type<tc>, window_params = [{transform_indices = @transform_0, window_bounds = array<i64: 16, 128>}, {transform_indices = @transform_1, window_bounds = array<i64: 128, 128>}, {transform_indices = @transform_2, window_bounds = array<i64: 128, 128>}, {transform_indices = @transform_3, window_bounds = array<i64: 16, 128>}]} {
    %c0 = arith.constant 0 : index
    %c0_0 = arith.constant 0 : index
    %0 = vector.load %arg2[%c0, %c0_0] : memref<16x128xbf16, #tpu.memory_space<vmem>>, vector<16x128xbf16>
    %c0_1 = arith.constant 0 : index
    %c0_2 = arith.constant 0 : index
    %1 = vector.load %arg3[%c0_1, %c0_2] : memref<128x128xbf16, #tpu.memory_space<vmem>>, vector<128x128xbf16>
    %cst = arith.constant dense<0.000000e+00> : vector<16x128xf32>
    %2 = tpu.matmul %0, %1, %cst {dimension_numbers = #tpu.dot_dimension_numbers<[1], [0], [0], [1], [0, 0, 1, 1], [], []>} : vector<16x128xbf16>, vector<128x128xbf16>, vector<16x128xf32> -> vector<16x128xf32>
    %3 = arith.truncf %2 : vector<16x128xf32> to vector<16x128xbf16>
    %cst_3 = arith.constant 0.000000e+00 : bf16
    %4 = vector.broadcast %cst_3 : bf16 to vector<16x128xbf16>
    %5 = arith.maximumf %3, %4 : vector<16x128xbf16>
    %c0_4 = arith.constant 0 : index
    %c0_5 = arith.constant 0 : index
    %6 = vector.load %arg4[%c0_4, %c0_5] : memref<128x128xbf16, #tpu.memory_space<vmem>>, vector<128x128xbf16>
    %cst_6 = arith.constant dense<0.000000e+00> : vector<16x128xf32>
    %7 = tpu.matmul %5, %6, %cst_6 {dimension_numbers = #tpu.dot_dimension_numbers<[1], [0], [0], [1], [0, 0, 1, 1], [], []>} : vector<16x128xbf16>, vector<128x128xbf16>, vector<16x128xf32> -> vector<16x128xf32>
    %c0_7 = arith.constant 0 : index
    %c0_8 = arith.constant 0 : index
    %8 = vector.load %arg5[%c0_7, %c0_8] : memref<16x128xf32, #tpu.memory_space<vmem>>, vector<16x128xf32>
    tpu.vector_store %arg5[%c0_7, %c0_8], %7 {strides = array<i32>} : memref<16x128xf32, #tpu.memory_space<vmem>>, vector<16x128xf32>,
    return
  }
  func.func @transform_0(%arg0: i32, %arg1: i32) -> (i32, i32) {
    %c0_i32 = arith.constant 0 : i32
    %c0_i32_0 = arith.constant 0 : i32
    return %arg0, %c0_i32 : i32, i32
  }
  func.func @transform_1(%arg0: i32, %arg1: i32) -> (i32, i32) {
    %c0_i32 = arith.constant 0 : i32
    %c0_i32_0 = arith.constant 0 : i32
    return %c0_i32, %arg1 : i32, i32
  }
  func.func @transform_2(%arg0: i32, %arg1: i32) -> (i32, i32) {
    %c0_i32 = arith.constant 0 : i32
    %c0_i32_0 = arith.constant 0 : i32
    return %arg1, %c0_i32 : i32, i32
  }
  func.func @transform_3(%arg0: i32, %arg1: i32) -> (i32, i32) {
    %c0_i32 = arith.constant 0 : i32
    %c0_i32_0 = arith.constant 0 : i32
    return %arg0, %c0_i32 : i32, i32
  }
}

</mosaic_0001>

<bundles_post_ra>
// kernel: tpu_custom_call.1
= control target key start
LH: loop header
LB: loop body
LE: loop exit
PB: predicated region body
PF: predicated region fallthrough
CT: control target
= control target key end

     0   :  { %8 = vsyncpa [#allocation4], 0  ;;  %s589_s0 = inlined_call_operand.hbm [shape: bf16[16,128], index: 0, kind: input, shape index: {}]   ;;  %s590_s1 = inlined_call_operand.hbm [shape: bf16[128,128], index: 1, kind: input, shape index: {}]   ;;  %s591_s2 = inlined_call_operand.hbm [shape: bf16[128,128], index: 2, kind: input, shape index: {}]   ;;  %s592_s3 = inlined_call_operand.hbm [shape: f32[16,128], index: 3, kind: output, shape index: {}]  }
   0x1   :  { %9 = vsyncpa [#allocation7], 0 }
   0x2   :  { %10 = vsyncpa [#allocation5], 0  ;;  %s494_s12 = smov [#allocation6]   ;;  %s495_s14 = smov [#allocation3]  }
   0x3   :  { %s28_s13 = sshll.u32 %s494_s12, 4  ;;  %s16_s15 = sshll.u32 %s495_s14, 4  ;;  %s29_s13 = int_to_ptr.vmem [resolvable:$true] %s28_s13  ;;  %s525_s15 = int_to_ptr.vmem [resolvable:$true] %s16_s15 }
   0x4   :  { %s400_s18 = scalar_lea.hbm %s590_s1, 1024 }
   0x5   :  { %p401_p0 = scmp.ne.s32.totalorder %s590_s1, %s400_s18  ;;  %p404_p1 = scmp.lt.u32.totalorder %s400_s18, %s590_s1 }
   0x7   :  { %p406_p2 = pnand %p404_p1, %p401_p0 }
   0x9   :  { %409 = shalt.err (!%p406_p2)
}
   0xa   :  { %s410_s23 = scalar_lea.vmem %s29_s13, 1024  ;;  %p415_p4 = scmp.lt.s32.totalorder %s29_s13, %s29_s13 }
   0xb   :  { %p411_p3 = scmp.ne.s32.totalorder %s29_s13, %s410_s23  ;;  %p416_p5 = scmp.lt.s32.totalorder %s410_s23, %s410_s23 }
   0xd   :  { %p417_p6 = por %p416_p5, %p415_p4 }
   0xf   :  { %p418_p7 = pnand %p417_p6, %p411_p3 }
  0x11   :  { %421 = shalt.err (!%p418_p7)
}
  0x12   :  { %s496_s24 = smov 64   ;;  %s497_s25 = smov 4  }
  0x13   :  { %34 = dma.hbm_to_vmem [thread:$0]  %s590_s1, 1024, %s29_s13, [#allocation7], %s496_s24, %s496_s24, %s497_s25  }
  0x14   :  { %s422_s30 = scalar_lea.hbm %s589_s0, 128 }
  0x15   :  { %p423_p8 = scmp.ne.s32.totalorder %s589_s0, %s422_s30  ;;  %p426_p9 = scmp.lt.u32.totalorder %s422_s30, %s589_s0 }
  0x17   :  { %p428_p10 = pnand %p426_p9, %p423_p8 }
  0x19   :  { %431 = shalt.err (!%p428_p10)
}
  0x1a   :  { %s432_s8 = scalar_lea.vmem %s525_s15, 128  ;;  %p437_p12 = scmp.lt.s32.totalorder %s525_s15, %s525_s15 }
  0x1b   :  { %p433_p11 = scmp.ne.s32.totalorder %s525_s15, %s432_s8  ;;  %p438_p13 = scmp.lt.s32.totalorder %s432_s8, %s432_s8 }
  0x1d   :  { %p439_p0 = por %p438_p13, %p437_p12 }
  0x1f   :  { %p440_p1 = pnand %p439_p0, %p433_p11 }
  0x21   :  { %443 = shalt.err (!%p440_p1)
}
  0x22   :  { %22 = dma.hbm_to_vmem [thread:$0]  %s589_s0, 128, %s525_s15, [#allocation4], %s496_s24, %s496_s24, %s497_s25  }
  0x23   :  { %s498_s10 = smov [#allocation8]   ;;  %s444_s14 = scalar_lea.hbm %s591_s2, 1024 }
  0x24   :  { %s40_s11 = sshll.u32 %s498_s10, 4  ;;  %p445_p2 = scmp.ne.s32.totalorder %s591_s2, %s444_s14  ;;  %s41_s11 = int_to_ptr.vmem [resolvable:$true] %s40_s11 }
  0x25   :  { %p448_p3 = scmp.lt.u32.totalorder %s444_s14, %s591_s2 }
  0x27   :  { %p450_p4 = pnand %p448_p3, %p445_p2 }
  0x29   :  { %453 = shalt.err (!%p450_p4)
}
  0x2a   :  { %s454_s20 = scalar_lea.vmem %s41_s11, 1024  ;;  %p459_p6 = scmp.lt.s32.totalorder %s41_s11, %s41_s11 }
  0x2b   :  { %p455_p5 = scmp.ne.s32.totalorder %s41_s11, %s454_s20  ;;  %p460_p7 = scmp.lt.s32.totalorder %s454_s20, %s454_s20 }
  0x2d   :  { %p461_p8 = por %p460_p7, %p459_p6 }
  0x2f   :  { %p462_p9 = pnand %p461_p8, %p455_p5 }
  0x31   :  { %465 = shalt.err (!%p462_p9)
}
  0x32   :  { %46 = dma.hbm_to_vmem [thread:$0]  %s591_s2, 1024, %s41_s11, [#allocation7], %s496_s24, %s496_s24, %s497_s25  }
  0x33   :  { %488 = dma.done.wait [#allocation4], 128  }
  0x34   :  { %489 = vsyncadd [#allocation4], 4294967168 }
  0x35   :  { %490 = dma.done.wait [#allocation7], 2048  }
  0x36   :  { %491 = vsyncadd [#allocation7], 4294965248  ;;  %v499_v0 = vmov 0.0   ;;  %vm500_vm0 = vmmov 0   ;;  %v383_v1 = vld [vmem:[#allocation6] sm:$0xff]   ;;  %v384_v2 = vld [vmem:[#allocation6 + $0x8] sm:$0xff]  }
  0x37   :  { %332 = vmatprep.subr.bf16.mxu0 %v499_v0  ;;  %348 = vmatprep.mubr.msk.bf16.mxu0 %vm500_vm0, %v499_v0  ;;  %v385_v3 = vld [vmem:[#allocation6 + $0x10] sm:$0xff]   ;;  %v392_v4 = vld [vmem:[#allocation8] sm:$0xff]   ;;  %v386_v5 = vld [vmem:[#allocation6 + $0x18] sm:$0xff]   ;;  %v501_v23 = vmov 0   ;;  %s502_s2 = smov [#allocation9]  }
  0x38   :  { %352 = vmatprep.subr.bf16.mxu1 %v499_v0  ;;  %368 = vmatprep.mubr.msk.bf16.mxu1 %vm500_vm0, %v499_v0  ;;  %v393_v6 = vld [vmem:[#allocation8 + $0x8] sm:$0xff]   ;;  %v387_v7 = vld [vmem:[#allocation6 + $0x20] sm:$0xff]   ;;  %v394_v8 = vld [vmem:[#allocation8 + $0x10] sm:$0xff]   ;;  %s284_s21 = sshll.u32 %s502_s2, 4  ;;  %s285_s21 = int_to_ptr.vmem [resolvable:$true] %s284_s21 }
  0x39   :  { %333 = vmatpush3.bf16.msra.mxu0 %v383_v1  ;;  %353 = vmatpush3.bf16.msra.mxu1 %v392_v4  ;;  %v388_v9 = vld [vmem:[#allocation6 + $0x28] sm:$0xff]   ;;  %v395_v10 = vld [vmem:[#allocation8 + $0x18] sm:$0xff]   ;;  %v389_v11 = vld [vmem:[#allocation6 + $0x30] sm:$0xff]   ;;  %s466_s22 = scalar_lea.vmem %s285_s21, 256  ;;  %p471_p11 = scmp.lt.s32.totalorder %s285_s21, %s285_s21 }
  0x3a   :  { %334 = vmatprep.subr.bf16.mxu0 %v499_v0  ;;  %354 = vmatprep.subr.bf16.mxu1 %v499_v0  ;;  %v396_v12 = vld [vmem:[#allocation8 + $0x20] sm:$0xff]   ;;  %v390_v13 = vld [vmem:[#allocation6 + $0x38] sm:$0xff]   ;;  %v397_v14 = vld [vmem:[#allocation8 + $0x28] sm:$0xff]   ;;  %p467_p10 = scmp.ne.s32.totalorder %s285_s21, %s466_s22  ;;  %p472_p12 = scmp.lt.s32.totalorder %s466_s22, %s466_s22 }
  0x3b   :  { %v391_v15 = vld [vmem:[#allocation3] sm:$0xff]   ;;  %v398_v16 = vld [vmem:[#allocation8 + $0x30] sm:$0xff]  }
  0x3c   :  { %v399_v17 = vld [vmem:[#allocation8 + $0x38] sm:$0xff]   ;;  %p473_p13 = por %p472_p12, %p471_p11 }
  0x3d   :  { %335 = vmatpush3.bf16.msra.mxu0 %v384_v2  ;;  %355 = vmatpush3.bf16.msra.mxu1 %v393_v6 }
  0x3e   :  { %336 = vmatprep.subr.bf16.mxu0 %v499_v0  ;;  %356 = vmatprep.subr.bf16.mxu1 %v499_v0  ;;  %p474_p0 = pnand %p473_p13, %p467_p10 }
  0x41   :  { %337 = vmatpush3.bf16.msra.mxu0 %v385_v3  ;;  %357 = vmatpush3.bf16.msra.mxu1 %v394_v8 }
  0x42   :  { %338 = vmatprep.subr.bf16.mxu0 %v499_v0  ;;  %358 = vmatprep.subr.bf16.mxu1 %v499_v0 }
  0x45   :  { %339 = vmatpush3.bf16.msra.mxu0 %v386_v5  ;;  %359 = vmatpush3.bf16.msra.mxu1 %v395_v10 }
  0x46   :  { %340 = vmatprep.subr.bf16.mxu0 %v499_v0  ;;  %360 = vmatprep.subr.bf16.mxu1 %v499_v0 }
  0x49   :  { %341 = vmatpush3.bf16.msra.mxu0 %v387_v7  ;;  %361 = vmatpush3.bf16.msra.mxu1 %v396_v12 }
  0x4a   :  { %342 = vmatprep.subr.bf16.mxu0 %v499_v0  ;;  %362 = vmatprep.subr.bf16.mxu1 %v499_v0 }
  0x4d   :  { %343 = vmatpush3.bf16.msra.mxu0 %v388_v9  ;;  %363 = vmatpush3.bf16.msra.mxu1 %v397_v14 }
  0x4e   :  { %344 = vmatprep.subr.bf16.mxu0 %v499_v0  ;;  %364 = vmatprep.subr.bf16.mxu1 %v499_v0 }
  0x51   :  { %345 = vmatpush3.bf16.msra.mxu0 %v389_v11  ;;  %365 = vmatpush3.bf16.msra.mxu1 %v398_v16 }
  0x52   :  { %346 = vmatprep.subr.bf16.mxu0 %v499_v0  ;;  %366 = vmatprep.subr.bf16.mxu1 %v499_v0 }
  0x55   :  { %347 = vmatpush3.bf16.msra.mxu0 %v390_v13  ;;  %367 = vmatpush3.bf16.msra.mxu1 %v399_v17 }
  0x58   :  { %349 = vmatmul.mubr.bf16.vlgmr.msra.gmra.mrb[0].mxu0 %v391_v15 }
 0x12b   :  { %v163_v18 = vpop.f32.mrb[0].mxu0 }
 0x12c   :  { %v350_v19 = vpop.f32.mrb[1].mxu0 }
 0x12d   :  { %v166_v20 = vpop.f32.mrb[2].mxu0 }
 0x12e   :  { %v170_v21 = vpack.c.bf16 %v166_v20, %v163_v18  ;;  %v351_v22 = vpop.f32.mrb[3].mxu0 }
 0x130   :  { %v171_v24 = vmax.bf16 %v501_v23, %v170_v21 }
 0x132   :  { %369 = vmatmul.mubr.bf16.vlgmr.msra.gmra.mrb[0].mxu1 %v171_v24 }
 0x205   :  { %v270_v25 = vpop.f32.mrb[0].mxu1 }
 0x206   :  { %277 = vst [vmem:[#allocation9] sm:$0xff] %v270_v25  ;;  %v370_v26 = vpop.f32.mrb[1].mxu1 }
 0x207   :  { %v273_v27 = vpop.f32.mrb[2].mxu1 }
 0x208   :  { %278 = vst [vmem:[#allocation9 + $0x8] sm:$0xff] %v273_v27  ;;  %v371_v28 = vpop.f32.mrb[3].mxu1 }
 0x209   :  { %477 = shalt.err (!%p474_p0)
}
 0x20a   :  { %s478_s25 = scalar_lea.hbm %s592_s3, 256 }
 0x20b   :  { %p479_p1 = scmp.ne.s32.totalorder %s592_s3, %s478_s25  ;;  %p482_p2 = scmp.lt.u32.totalorder %s478_s25, %s592_s3 }
 0x20d   :  { %p484_p3 = pnand %p482_p2, %p479_p1 }
 0x20f   :  { %487 = shalt.err (!%p484_p3)
}
 0x210   :  { %s503_s30 = smov 128   ;;  %s504_s4 = smov 8  }
 0x211   :  { %290 = dma.vmem_to_hbm [thread:$0]  %s285_s21, 256, %s592_s3, [#allocation5], %s503_s30, %s503_s30, %s504_s4  }
 0x212   :  { %492 = dma.done.wait [#allocation5], 256  }
 0x213   :  { %493 = vsyncadd [#allocation5], 4294967040 }
 0x214   :  { %294 = vsyncpa [#allocation4], 1 }
 0x215   :  { %295 = vsyncpa [#allocation7], 1 }
 0x216   :  { %296 = vsyncpa [#allocation5], 1 }

</bundles_post_ra>
